<compile_context>
chip_gen: v6e
topology: v6e:2x2x1
jax: 0.10.0
libtpu: 0.0.40
codegen_flags: <defaults>
</compile_context>

<pallas_src>
import functools

import jax
import jax.numpy as jnp
from jax import lax
from jax.experimental import pallas as pl
from jax.experimental.pallas import tpu as pltpu

EPS = 1e-5
LANE = 128


def _round_up(x, m):
    return (x + m - 1) // m * m


def _mask_rows(a, tile_idx, tm, m_actual):
    """Zero out rows past the true M (row padding must not pollute BN stats)."""
    rows = tile_idx * tm + lax.broadcasted_iota(jnp.int32, (tm, 1), 0)
    return jnp.where(rows < m_actual, a, 0.0)


# ----------------------------------------------------------------------------
# Pass 1: per-tile partial sum / sum-of-squares of a1 = x @ W1 + b1
# ----------------------------------------------------------------------------
def _stats1_kernel(x_ref, w1_ref, b1_ref, stat_ref, *,
                   tm, m_actual, need_mask, compute_dtype):
    i = pl.program_id(0)
    x = x_ref[...].astype(compute_dtype)
    a1 = jnp.dot(x, w1_ref[...], preferred_element_type=jnp.float32) + b1_ref[...]
    if need_mask:
        a1 = _mask_rows(a1, i, tm, m_actual)
    hp = a1.shape[1]
    ssum = jnp.sum(a1, axis=0, keepdims=True)
    ssq = jnp.sum(a1 * a1, axis=0, keepdims=True)
    stat_ref[...] = jnp.concatenate(
        [ssum, ssq, jnp.zeros((6, hp), jnp.float32)], axis=0)[None]


# ----------------------------------------------------------------------------
# Pass 2: recompute a1, apply folded BN1 + relu, partial stats of
#         a2 = h @ W2 + b2
# ----------------------------------------------------------------------------
def _stats2_kernel(x_ref, w1_ref, b1_ref, s1_ref, t1_ref, w2_ref, b2_ref,
                   stat_ref, *, tm, m_actual, need_mask, compute_dtype):
    i = pl.program_id(0)
    x = x_ref[...].astype(compute_dtype)
    a1 = jnp.dot(x, w1_ref[...], preferred_element_type=jnp.float32) + b1_ref[...]
    h = jnp.maximum(a1 * s1_ref[...] + t1_ref[...], 0.0)
    a2 = jnp.dot(h.astype(compute_dtype), w2_ref[...],
                 preferred_element_type=jnp.float32) + b2_ref[...]
    if need_mask:
        a2 = _mask_rows(a2, i, tm, m_actual)
    cp = a2.shape[1]
    ssum = jnp.sum(a2, axis=0, keepdims=True)
    ssq = jnp.sum(a2 * a2, axis=0, keepdims=True)
    stat_ref[...] = jnp.concatenate(
        [ssum, ssq, jnp.zeros((6, cp), jnp.float32)], axis=0)[None]


# ----------------------------------------------------------------------------
# Pass 3: full forward with folded BN scale/shift, residual add, final relu
# ----------------------------------------------------------------------------
def _final_kernel(x_ref, w1_ref, b1_ref, s1_ref, t1_ref, w2_ref, b2_ref,
                  s2_ref, t2_ref, o_ref, *, compute_dtype):
    x32 = x_ref[...].astype(jnp.float32)
    a1 = jnp.dot(x32.astype(compute_dtype), w1_ref[...],
                 preferred_element_type=jnp.float32) + b1_ref[...]
    h = jnp.maximum(a1 * s1_ref[...] + t1_ref[...], 0.0)
    a2 = jnp.dot(h.astype(compute_dtype), w2_ref[...],
                 preferred_element_type=jnp.float32) + b2_ref[...]
    y = a2 * s2_ref[...] + t2_ref[...]
    o_ref[...] = jnp.maximum(y + x32, 0.0).astype(o_ref.dtype)


# ----------------------------------------------------------------------------
# Wrapper
# ----------------------------------------------------------------------------
def conv_bn_relu_res1d(x_ncl, params, *, tm=512,
                       compute_dtype=jnp.bfloat16,
                       vmem_limit_bytes=32 * 1024 * 1024):
    """x_ncl: (N, C, L) float32; params from init_params. Returns (N, C, L)."""
    N, C, L = x_ncl.shape
    H = params["w1"].shape[1]
    M = N * L

    Cp = _round_up(C, LANE)
    Hp = _round_up(H, LANE)
    tm = _round_up(min(tm, _round_up(M, 8)), 8)
    Mp = _round_up(M, tm)
    num_tiles = Mp // tm
    need_mask = (Mp != M)

    # NCL -> lane-dense (M, C) slab, zero-pad rows and channels.
    x2d = jnp.transpose(x_ncl, (0, 2, 1)).reshape(M, C).astype(jnp.float32)
    x2d = jnp.pad(x2d, ((0, Mp - M), (0, Cp - C)))

    def pad2(a, r, c):
        return jnp.pad(a, ((0, r - a.shape[0]), (0, c - a.shape[1])))

    w1p = pad2(params["w1"], Cp, Hp).astype(compute_dtype)
    b1p = pad2(params["b1"], 1, Hp).astype(jnp.float32)
    g1p = pad2(params["g1"], 1, Hp).astype(jnp.float32)
    be1p = pad2(params["be1"], 1, Hp).astype(jnp.float32)
    w2p = pad2(params["w2"], Hp, Cp).astype(compute_dtype)
    b2p = pad2(params["b2"], 1, Cp).astype(jnp.float32)
    g2p = pad2(params["g2"], 1, Cp).astype(jnp.float32)
    be2p = pad2(params["be2"], 1, Cp).astype(jnp.float32)

    cparams = pltpu.CompilerParams(
        dimension_semantics=("parallel",),
        vmem_limit_bytes=vmem_limit_bytes,
    )

    x_spec = pl.BlockSpec((tm, Cp), lambda i: (i, 0))

    def row_spec(nc):
        return pl.BlockSpec((1, nc), lambda i: (0, 0))

    # ---- pass 1: BN1 statistics ---------------------------------------------
    stats1 = pl.pallas_call(
        functools.partial(_stats1_kernel, tm=tm, m_actual=M,
                          need_mask=need_mask, compute_dtype=compute_dtype),
        grid=(num_tiles,),
        in_specs=[x_spec,
                  pl.BlockSpec((Cp, Hp), lambda i: (0, 0)),
                  row_spec(Hp)],
        out_specs=pl.BlockSpec((1, 8, Hp), lambda i: (i, 0, 0)),
        out_shape=jax.ShapeDtypeStruct((num_tiles, 8, Hp), jnp.float32),
        compiler_params=cparams,
    )(x2d, w1p, b1p)

    sum1 = jnp.sum(stats1[:, 0, :], axis=0, keepdims=True)
    sumsq1 = jnp.sum(stats1[:, 1, :], axis=0, keepdims=True)
    mu1 = sum1 / M
    var1 = jnp.maximum(sumsq1 / M - mu1 * mu1, 0.0)   # biased, E[x^2]-mu^2
    rstd1 = lax.rsqrt(var1 + EPS)
    s1 = g1p * rstd1
    t1 = be1p - mu1 * s1

    # ---- pass 2: BN2 statistics ---------------------------------------------
    stats2 = pl.pallas_call(
        functools.partial(_stats2_kernel, tm=tm, m_actual=M,
                          need_mask=need_mask, compute_dtype=compute_dtype),
        grid=(num_tiles,),
        in_specs=[x_spec,
                  pl.BlockSpec((Cp, Hp), lambda i: (0, 0)),
                  row_spec(Hp), row_spec(Hp), row_spec(Hp),
                  pl.BlockSpec((Hp, Cp), lambda i: (0, 0)),
                  row_spec(Cp)],
        out_specs=pl.BlockSpec((1, 8, Cp), lambda i: (i, 0, 0)),
        out_shape=jax.ShapeDtypeStruct((num_tiles, 8, Cp), jnp.float32),
        compiler_params=cparams,
    )(x2d, w1p, b1p, s1, t1, w2p, b2p)

    sum2 = jnp.sum(stats2[:, 0, :], axis=0, keepdims=True)
    sumsq2 = jnp.sum(stats2[:, 1, :], axis=0, keepdims=True)
    mu2 = sum2 / M
    var2 = jnp.maximum(sumsq2 / M - mu2 * mu2, 0.0)
    rstd2 = lax.rsqrt(var2 + EPS)
    s2 = g2p * rstd2
    t2 = be2p - mu2 * s2

    # ---- pass 3: normalize + residual + relu --------------------------------
    out2d = pl.pallas_call(
        functools.partial(_final_kernel, compute_dtype=compute_dtype),
        grid=(num_tiles,),
        in_specs=[x_spec,
                  pl.BlockSpec((Cp, Hp), lambda i: (0, 0)),
                  row_spec(Hp), row_spec(Hp), row_spec(Hp),
                  pl.BlockSpec((Hp, Cp), lambda i: (0, 0)),
                  row_spec(Cp), row_spec(Cp), row_spec(Cp)],
        out_specs=pl.BlockSpec((tm, Cp), lambda i: (i, 0)),
        out_shape=jax.ShapeDtypeStruct((Mp, Cp), x_ncl.dtype),
        compiler_params=cparams,
    )(x2d, w1p, b1p, s1, t1, w2p, b2p, s2, t2)

    out2d = out2d[:M, :C]
    return jnp.transpose(out2d.reshape(N, L, C), (0, 2, 1))


# ----------------------------------------------------------------------------
# Pure-JAX reference (same semantics; matmuls in the same compute dtype so the
# comparison isolates kernel bugs rather than bf16 rounding).
# ----------------------------------------------------------------------------
def _reference(x_ncl, params, compute_dtype=jnp.bfloat16):
    N, C, L = x_ncl.shape
    x2d = jnp.transpose(x_ncl, (0, 2, 1)).reshape(N * L, C).astype(jnp.float32)

    a1 = jnp.dot(x2d.astype(compute_dtype), params["w1"].astype(compute_dtype),
                 preferred_element_type=jnp.float32) + params["b1"]
    mu1 = a1.mean(0, keepdims=True)
    var1 = ((a1 - mu1) ** 2).mean(0, keepdims=True)
    h = jnp.maximum((a1 - mu1) * lax.rsqrt(var1 + EPS) * params["g1"]
                    + params["be1"], 0.0)

    a2 = jnp.dot(h.astype(compute_dtype), params["w2"].astype(compute_dtype),
                 preferred_element_type=jnp.float32) + params["b2"]
    mu2 = a2.mean(0, keepdims=True)
    var2 = ((a2 - mu2) ** 2).mean(0, keepdims=True)
    y = (a2 - mu2) * lax.rsqrt(var2 + EPS) * params["g2"] + params["be2"]

    out2d = jnp.maximum(y + x2d, 0.0)
    return jnp.transpose(out2d.reshape(N, L, C), (0, 2, 1))


def init_params(key, channel, res_expansion=1.0):
    """Parameters matching the module's shapes (Conv1d weight stored as (in, out))."""
    hidden = int(channel * res_expansion)
    k1, k2, k3, k4 = jax.random.split(key, 4)
    return {
        "w1": (jax.random.normal(k1, (channel, hidden), jnp.float32)
               * (1.0 / jnp.sqrt(channel))),
        "b1": jax.random.normal(k2, (1, hidden), jnp.float32) * 0.1,
        "g1": jnp.ones((1, hidden), jnp.float32),
        "be1": jnp.zeros((1, hidden), jnp.float32),
        "w2": (jax.random.normal(k3, (hidden, channel), jnp.float32)
               * (1.0 / jnp.sqrt(hidden))),
        "b2": jax.random.normal(k4, (1, channel), jnp.float32) * 0.1,
        "g2": jnp.ones((1, channel), jnp.float32),
        "be2": jnp.zeros((1, channel), jnp.float32),
    }


if __name__ == "__main__":
    key = jax.random.PRNGKey(0)
    kx, kp = jax.random.split(key)

    # Small shapes consistent with the module's NCL Conv1d interface.
    N, C, L = 2, 16, 300          # M = 600 -> exercises multi-tile grid + row mask
    res_expansion = 1.0

    x = jax.random.normal(kx, (N, C, L), jnp.float32)
    params = init_params(kp, C, res_expansion)

    out = conv_bn_relu_res1d(x, params, tm=256)
    out = jax.block_until_ready(out)

    ref = _reference(x, params)
    assert out.shape == (N, C, L)
    assert jnp.allclose(out, ref, atol=2e-3, rtol=2e-3), "mismatch vs reference"

    print("KERNEL_OK")
</pallas_src>

<mosaic_0001>
module attributes {stable_mosaic.version = 11 : i64} {
  func.func @_stats1_kernel(%arg0: i32, %arg1: memref<256x128xf32, #tpu.memory_space<vmem>>, %arg2: memref<128x128xbf16, #tpu.memory_space<vmem>>, %arg3: memref<1x128xf32, #tpu.memory_space<vmem>>, %arg4: memref<1x8x128xf32, #tpu.memory_space<vmem>>) attributes {dimension_semantics = [#tpu.dimension_semantics<parallel>], iteration_bounds = array<i64: 3>, scalar_prefetch = 0 : i64, scratch_operands = 0 : i64, tpu.core_type = #tpu.core_type<tc>, window_params = [{transform_indices = @transform_0, window_bounds = array<i64: 256, 128>}, {pipeline_mode = #tpu.pipeline_mode<synchronous>, transform_indices = @transform_1, window_bounds = array<i64: 128, 128>}, {pipeline_mode = #tpu.pipeline_mode<synchronous>, transform_indices = @transform_2, window_bounds = array<i64: 1, 128>}, {transform_indices = @transform_3, window_bounds = array<i64: 1, 8, 128>}]} {
    %c0 = arith.constant 0 : index
    %c0_0 = arith.constant 0 : index
    %0 = vector.load %arg1[%c0, %c0_0] : memref<256x128xf32, #tpu.memory_space<vmem>>, vector<256x128xf32>
    %1 = arith.truncf %0 : vector<256x128xf32> to vector<256x128xbf16>
    %c0_1 = arith.constant 0 : index
    %c0_2 = arith.constant 0 : index
    %2 = vector.load %arg2[%c0_1, %c0_2] : memref<128x128xbf16, #tpu.memory_space<vmem>>, vector<128x128xbf16>
    %cst = arith.constant dense<0.000000e+00> : vector<256x128xf32>
    %3 = tpu.matmul %1, %2, %cst {dimension_numbers = #tpu.dot_dimension_numbers<[1], [0], [0], [1], [0, 0, 1, 1], [], []>} : vector<256x128xbf16>, vector<128x128xbf16>, vector<256x128xf32> -> vector<256x128xf32>
    %c0_3 = arith.constant 0 : index
    %c0_4 = arith.constant 0 : index
    %4 = vector.load %arg3[%c0_3, %c0_4] : memref<1x128xf32, #tpu.memory_space<vmem>>, vector<1x128xf32>
    %5 = vector.broadcast %4 : vector<1x128xf32> to vector<256x128xf32>
    %6 = arith.addf %3, %5 : vector<256x128xf32>
    %c256_i32 = arith.constant 256 : i32
    %7 = arith.muli %arg0, %c256_i32 : i32
    %8 = tpu.iota {dimensions = array<i32: 0>} : vector<256x1xi32>
    %9 = vector.broadcast %7 : i32 to vector<256x1xi32>
    %10 = arith.addi %9, %8 : vector<256x1xi32>
    %c600_i32 = arith.constant 600 : i32
    %11 = vector.broadcast %c600_i32 : i32 to vector<256x1xi32>
    %12 = arith.cmpi slt, %10, %11 : vector<256x1xi32>
    %cst_5 = arith.constant 0.000000e+00 : f32
    %13 = vector.shape_cast %12 : vector<256x1xi1> to vector<256x1xi1>
    %14 = vector.broadcast %13 : vector<256x1xi1> to vector<256x128xi1>
    %15 = vector.broadcast %cst_5 : f32 to vector<256x128xf32>
    %16 = arith.select %14, %6, %15 : vector<256x128xi1>, vector<256x128xf32>
    %cst_6 = arith.constant dense<0.000000e+00> : vector<128xf32>
    %17 = vector.multi_reduction <add>, %16, %cst_6 [0] : vector<256x128xf32> to vector<128xf32>
    %18 = vector.shape_cast %17 : vector<128xf32> to vector<1x128xf32>
    %19 = arith.mulf %16, %16 : vector<256x128xf32>
    %cst_7 = arith.constant dense<0.000000e+00> : vector<128xf32>
    %20 = vector.multi_reduction <add>, %19, %cst_7 [0] : vector<256x128xf32> to vector<128xf32>
    %21 = vector.shape_cast %20 : vector<128xf32> to vector<1x128xf32>
    %cst_8 = arith.constant 0.000000e+00 : f32
    %22 = vector.broadcast %cst_8 : f32 to vector<6x128xf32>
    %23 = tpu.concatenate %18, %21, %22 in 0 : vector<1x128xf32>, vector<1x128xf32>, vector<6x128xf32> -> vector<8x128xf32>
    %24 = vector.shape_cast %23 : vector<8x128xf32> to vector<1x8x128xf32>
    %c0_9 = arith.constant 0 : index
    %c0_10 = arith.constant 0 : index
    %c0_11 = arith.constant 0 : index
    %25 = vector.load %arg4[%c0_9, %c0_10, %c0_11] : memref<1x8x128xf32, #tpu.memory_space<vmem>>, vector<1x8x128xf32>
    tpu.vector_store %arg4[%c0_9, %c0_10, %c0_11], %24 {strides = array<i32>} : memref<1x8x128xf32, #tpu.memory_space<vmem>>, vector<1x8x128xf32>,
    return
  }
  func.func @transform_0(%arg0: i32) -> (i32, i32) {
    %c0_i32 = arith.constant 0 : i32
    %c0_i32_0 = arith.constant 0 : i32
    return %arg0, %c0_i32 : i32, i32
  }
  func.func @transform_1(%arg0: i32) -> (i32, i32) {
    %c0_i32 = arith.constant 0 : i32
    %c0_i32_0 = arith.constant 0 : i32
    %c0_i32_1 = arith.constant 0 : i32
    return %c0_i32, %c0_i32_0 : i32, i32
  }
  func.func @transform_2(%arg0: i32) -> (i32, i32) {
    %c0_i32 = arith.constant 0 : i32
    %c0_i32_0 = arith.constant 0 : i32
    %c0_i32_1 = arith.constant 0 : i32
    return %c0_i32, %c0_i32_0 : i32, i32
  }
  func.func @transform_3(%arg0: i32) -> (i32, i32, i32) {
    %c0_i32 = arith.constant 0 : i32
    %c0_i32_0 = arith.constant 0 : i32
    %c0_i32_1 = arith.constant 0 : i32
    return %arg0, %c0_i32, %c0_i32_0 : i32, i32, i32
  }
}

</mosaic_0001>

<bundles_post_ra>
// kernel: tpu_custom_call.1
= control target key start
LH: loop header
LB: loop body
LE: loop exit
PB: predicated region body
PF: predicated region fallthrough
CT: control target
= control target key end

     0   :  { %8 = vsyncpa [#allocation3], 0  ;;  %s1581_s0 = inlined_call_operand.hbm [shape: f32[768,128], index: 0, kind: input, shape index: {}]   ;;  %s1582_s1 = inlined_call_operand.hbm [shape: bf16[128,128], index: 1, kind: input, shape index: {}]   ;;  %s1583_s2 = inlined_call_operand.vmem [shape: f32[1,128], index: 2, kind: input, shape index: {}]   ;;  %s1584_s3 = inlined_call_operand.hbm [shape: f32[3,8,128], index: 3, kind: output, shape index: {}]  }
   0x1   :  { %10 = vsyncpa [#allocation3 + $0x1], 0 }
   0x2   :  { %11 = vsyncpa [#allocation6], 0 }
   0x3   :  { %12 = vsyncpa [#allocation4], 0 }
   0x4   :  { %14 = vsyncpa [#allocation4 + $0x1], 0  ;;  %s1220_s12 = smov 0   ;;  %s1222_s13 = smov 0  }
   0x5   :  { %s1224_s14 = smov 0   ;;  %s1226_s15 = smov 0  }
   0x6 LB: > { %s1241_s16 = sadd.s32 4294967295, %s1191_s15   ;;  %s886_s17 = sadd.s32 4294967294, %s1191_s15   ;;  %s1191_s15 = sphi %s1226_s15, %s1605_s15   ;;  %s1187_s14 = sphi %s1224_s14, %s1604_s14   ;;  %s1183_s13 = sphi %s1222_s13, %s1603_s13   ;;  %s1179_s12 = sphi %s1220_s12, %s1602_s12  }
   0x7   : > { %p40_p0 = scmp.ne.s32.totalorder %s1183_s13, %s1179_s12  ;;  %p1585_p1 = scmp.eq.s32.totalorder %s1241_s16, 0 }
   0x8   : > { %p112_p3 = scmp.eq.s32.totalorder %s886_s17, 2  ;;  %p887_p5 = scmp.ge.s32.totalorder %s1191_s15, 1 }
   0x9   : > { %p1250_p4 = por %p1585_p1, %p40_p0  ;;  %p119_p7 = scmp.lt.s32.totalorder %s1191_s15, 4 }
   0xa   : > { %p1255_p6 = por %p112_p3, %p40_p0  ;;  %s1193_s21 = smov [#allocation5]  }
   0xb   : > { %s1589_s18 = scalar_select %p1250_p4, 1, 0 }
   0xc   : > { %s1590_s19 = scalar_select %p1255_p6, 1, 0 }
   0xd   : > { %p1260_p8 = pnand %p887_p5, %p119_p7  ;;  %s131_s22 = sshll.u32 %s1193_s21, 4  ;;  %s132_s22 = int_to_ptr.vmem [resolvable:$true] %s131_s22 }
   0xe   : > { %s1273_s24 = sadd.s32 1, %s1191_s15   ;;  %s27_s25 = sadd.s32 1, %s1187_s14 }
   0xf   : > { %s1591_s20 = scalar_select %p1260_p8, 1, 0 }
  0x10   : > { %p1008_p9 = pneg %p1260_p8  ;;  %s24_s26 = ssub.s32 %s1191_s15, %s1273_s24 }
  0x11   : > { %s1080_s27 = scalar_lea.vmem %s132_s22, 1024  ;;  %p1088_p3 = scmp.lt.s32.totalorder %s132_s22, %s132_s22 }
  0x12   : > { %p1268_p10 = pnand %p1008_p9, %p1585_p1  ;;  %p1081_p12 = scmp.ne.s32.totalorder %s132_s22, %s1080_s27 }
  0x13   : > { %p1089_p5 = scmp.lt.s32.totalorder %s1080_s27, %s1080_s27 }
  0x14   : > { %p1071_p11 = pneg %p1268_p10 }
  0x15   : > { %p1090_p7 = por %p1089_p5, %p1088_p3 }
  0x16   : > { %p1083_p13 = pnand %p1081_p12, %p1071_p11 }
  0x18   : > { %p1084_p0 = pneg %p1083_p13 }
  0x1a   : > { %p1091_p2 = pnand %p1090_p7, %p1084_p0 }
  0x1c   : > { %1094 = shalt.err (!%p1091_p2)
}
  0x1d   : > { %s1194_s28 = smov 64   ;;  %s1195_s29 = smov 4  }
  0x1e   : > { %1011 = dma.hbm_to_vmem [thread:$0]  (!%p1268_p10), %s1582_s1, 1024, %s132_s22, [#allocation6], %s1194_s28, %s1194_s28, %s1195_s29  }
  0x1f   : > { %p25_p9 = scmp.eq.s32.totalorder %s24_s26, 0  ;;  %p34_p11 = scmp.ne.s32.totalorder %s1187_s14, %s1183_s13 }
  0x20   : > { %p35_p12 = scmp.eq.s32.totalorder %s1191_s15, 0  ;;  %p1021_p2 = scmp.lt.s32.totalorder %s1191_s15, 3 }
  0x21   : > { %s1290_s5 = scalar_select %p25_p9, %s1187_s14, %s27_s25  }
  0x22   : > { %p36_p13 = por %p35_p12, %p34_p11  ;;  %p1593_p0 = scmp.eq.s32.totalorder %s1241_s16, 2 }
  0x23   : > { %s148_s7 = sand.u32 1, %s1187_s14   ;;  %s911_s8 = sshll.u32 %s1191_s15, 12 }
  0x24   : > { %p1294_p3 = por %p1593_p0, %p34_p11  ;;  %s890_s9 = sshll.u32 %s148_s7, 8 }
  0x25   : > { %s1303_s17 = scalar_lea.hbm %s1581_s0, %s911_s8  ;;  %s152_s21 = scalar_lea.vmem [#allocation2], %s890_s9 }
  0x26   : > { %s1594_s6 = scalar_select %p1294_p3, 1, 0 }
  0x27   : > { %s159_s22 = sshll.u32 %s152_s21, 4  ;;  %p1305_p10 = pnand %p1021_p2, %p36_p13  ;;  %s1309_s22 = int_to_ptr.vmem [resolvable:$true] %s159_s22 }
  0x28   : > { %s1311_s25 = scalar_lea.sflag [#allocation3], %s148_s7  ;;  %s1095_s26 = scalar_lea.hbm %s1303_s17, 4096 }
  0x29   : > { %p1096_p5 = scmp.ne.s32.totalorder %s1303_s17, %s1095_s26  ;;  %p1097_p7 = pneg %p1305_p10 }
  0x2a   : > { %s1100_s29 = scalar_lea.hbm %s1581_s0, 12288  ;;  %p1101_p12 = scmp.lt.s32.totalorder %s1303_s17, %s1581_s0 }
  0x2b   : > { %p1098_p9 = pnand %p1097_p7, %p1096_p5  ;;  %p1102_p2 = scmp.lt.s32.totalorder %s1100_s29, %s1095_s26 }
  0x2d   : > { %p1099_p11 = pneg %p1098_p9  ;;  %p1103_p13 = por %p1102_p2, %p1101_p12 }
  0x2f   : > { %p1104_p0 = pnand %p1103_p13, %p1099_p11 }
  0x31   : > { %1107 = shalt.err (!%p1104_p0)
}
  0x32   : > { %s1108_s7 = scalar_lea.vmem %s1309_s22, 4096  ;;  %s1196_s8 = smov [#allocation2]  }
  0x33   : > { %p1109_p1 = scmp.ne.s32.totalorder %s1309_s22, %s1108_s7  ;;  %s1113_s9 = sshll.u32 %s1196_s8, 4  ;;  %s1114_s9 = int_to_ptr.vmem [resolvable:$false] %s1113_s9 }
  0x34   : > { %s1115_s10 = scalar_lea.vmem %s1114_s9, 8192  ;;  %p1116_p9 = scmp.lt.s32.totalorder %s1309_s22, %s1114_s9 }
  0x35   : > { %p1111_p6 = pnand %p1109_p1, %p1097_p7  ;;  %p1117_p3 = scmp.lt.s32.totalorder %s1115_s10, %s1108_s7 }
  0x37   : > { %p1112_p5 = pneg %p1111_p6  ;;  %p1118_p4 = por %p1117_p3, %p1116_p9 }
  0x39   : > { %p1119_p8 = pnand %p1118_p4, %p1112_p5 }
  0x3b   : > { %1122 = shalt.err (!%p1119_p8)
}
  0x3c   : > { %s1197_s11 = smov 128   ;;  %s1198_s21 = smov 8  }
  0x3d   : > { %1015 = dma.hbm_to_vmem [thread:$0]  (!%p1305_p10), %s1303_s17, 4096, %s1309_s22, %s1311_s25, %s1197_s11, %s1197_s11, %s1198_s21  }
  0x3e   : > { %p1596_p1 = scmp.ne.s32.totalorder %s1591_s20, 0 }
  0x3f   : > { %s1335_s26 = sand.u32 (!%p1596_p1), 1, %s1183_s13   ;;  %p1597_p4 = scmp.ne.s32.totalorder (!%p1596_p1), %s1589_s18, 0 }
  0x40   : > { %171 = sbr.rel (%p1596_p1) target bundleno = 399 (0x18f), region = 32  ;;  %s894_s27 = sshll.u32 (!%p1596_p1), %s1335_s26, 8 }
  0x41   : > { %s174_s28 = scalar_lea.sflag (!%p1596_p1), [#allocation3], %s1335_s26  ;;  %s1339_s29 = scalar_lea.vmem (!%p1596_p1), [#allocation2], %s894_s27 }
  0x45   : > { %1166 = dma.done.wait (%p1597_p4), %s174_s28, 4096  }
  0x46   : > { %1168 = vsyncadd (%p1597_p4), %s174_s28, 4294963200  ;;  %p1598_p6 = scmp.eq.s32.totalorder %s1241_s16, 0 }
  0x48   : > { %1170 = dma.done.wait (%p1598_p6), [#allocation6], 1024   ;;  %p1599_p8 = pmov %p1598_p6 }
  0x49   : > { %v1061_v0 = vld [vmem:[#allocation5 + $0x38] sm:$0xff]   ;;  %v1062_v1 = vld [vmem:[#allocation5 + $0x30] sm:$0xff]   ;;  %v1063_v2 = vld [vmem:[#allocation5 + $0x28] sm:$0xff]   ;;  %v487_v56 = vlaneseq  ;;  %s906_s18 = sshll.u32 %s1241_s16, 8  ;;  %s896_s22 = sshll.u32 %s1335_s26, 3 }
  0x4a   : > { %1172 = vsyncadd (%p1599_p8), [#allocation6], 4294966272  ;;  %936 = vmatprep.subr.bf16.mxu0 %v1061_v0  ;;  %984 = vmatprep.subr.bf16.mxu1 %v1061_v0  ;;  %v1064_v3 = vld [vmem:[#allocation5 + $0x20] sm:$0xff]   ;;  %v207_v5 = vld [vmem:[%s1339_s29 + $0x8] sm:$0xff]  ;;  %v1386_v60 = vstv %s906_s18  ;;  %s908_s23 = sshll.u32 %s1241_s16, 7  ;;  %s203_s25 = scalar_lea.vmem [#allocation7], %s896_s22 }
  0x4b   : > { %937 = vmatpush3.bf16.msra.mxu0 %v1061_v0  ;;  %992 = vmatpush3.bf16.msra.mxu1 %v1061_v0  ;;  %v206_v4 = vld [vmem:[%s1339_s29] sm:$0xff]  ;;  %v1065_v7 = vld [vmem:[#allocation5 + $0x18] sm:$0xff]   ;;  %v223_v9 = vld [vmem:[%s1339_s29 + $0x88] sm:$0xff]  ;;  %v1381_v57 = vshrl.u32 %v487_v56, 7  ;;  %s806_s30 = sshll.u32 %s203_s25, 4  ;;  %s1545_s8 = scalar_lea.hbm %s1584_s3, %s908_s23  ;;  %s807_s30 = int_to_ptr.vmem [resolvable:$true] %s806_s30 }
  0x4c   : > { %938 = vmatprep.subr.bf16.mxu0 %v1062_v1  ;;  %985 = vmatprep.subr.bf16.mxu1 %v1062_v1  ;;  %v238_v6 = vpack.c.bf16 %v207_v5, %v206_v4  ;;  %v222_v8 = vld [vmem:[%s1339_s29 + $0x80] sm:$0xff]  ;;  %v1066_v11 = vld [vmem:[#allocation5 + $0x10] sm:$0xff]   ;;  %v1067_v12 = vld [vmem:[#allocation5 + $0x8] sm:$0xff]   ;;  %s793_s9 = scalar_lea.sflag [#allocation4], %s1335_s26  ;;  %s1123_s10 = scalar_lea.vmem %s807_s30, 128 }
  0x4d   : > { %v246_v10 = vpack.c.bf16 %v223_v9, %v222_v8  ;;  %v1068_v13 = vld [vmem:[#allocation5] sm:$0xff]   ;;  %v208_v14 = vld [vmem:[%s1339_s29 + $0x10] sm:$0xff]  ;;  %v209_v15 = vld [vmem:[%s1339_s29 + $0x18] sm:$0xff]  ;;  %v490_v58 = vadd.s32 16, %v1381_v57  ;;  %v489_v59 = vadd.s32 8, %v1381_v57  ;;  %v521_v62 = vadd.s32 %v1386_v60, %v1381_v57  ;;  %p1124_p3 = scmp.ne.s32.totalorder %s807_s30, %s1123_s10  ;;  %p1600_p10 = scmp.ne.s32.totalorder %s1594_s6, 0 }
  0x4e   : > { %952 = vmatprep.mubr.bf16.mxu0 %v238_v6  ;;  %v210_v16 = vld [vmem:[%s1339_s29 + $0x20] sm:$0xff]  ;;  %v211_v17 = vld [vmem:[%s1339_s29 + $0x28] sm:$0xff]  ;;  %v224_v18 = vld [vmem:[%s1339_s29 + $0x90] sm:$0xff]  ;;  %v239_v22 = vpack.c.bf16 %v209_v15, %v208_v14  ;;  %v491_v63 = vadd.s32 24, %v1381_v57  ;;  %v492_v0 = vadd.s32 32, %v1381_v57  ;;  %v494_v6 = vadd.s32 48, %v1381_v57 }
  0x4f   : > { %939 = vmatpush3.bf16.msra.mxu0 %v1062_v1  ;;  %993 = vmatpush3.bf16.msra.mxu1 %v1062_v1  ;;  %v225_v19 = vld [vmem:[%s1339_s29 + $0x98] sm:$0xff]  ;;  %v226_v20 = vld [vmem:[%s1339_s29 + $0xa0] sm:$0xff]  ;;  %v227_v21 = vld [vmem:[%s1339_s29 + $0xa8] sm:$0xff]  ;;  %v240_v23 = vpack.c.bf16 %v211_v17, %v210_v16  ;;  %v522_v5 = vadd.s32 %v1386_v60, %v489_v59  ;;  %vm553_vm0 = vcmp.lt.s32.totalorder %v521_v62, 600  ;;  %v500_v56 = vadd.s32 96, %v1381_v57  ;;  %p1125_p7 = pnand %p1124_p3, %p1600_p10  ;;  %s1199_s16 = smov [#allocation7]  }
  0x50   : > { %940 = vmatprep.subr.bf16.mxu0 %v1063_v2  ;;  %986 = vmatprep.subr.bf16.mxu1 %v1063_v2  ;;  %v247_v24 = vpack.c.bf16 %v225_v19, %v224_v18  ;;  %v248_v25 = vpack.c.bf16 %v227_v21, %v226_v20  ;;  %v212_v26 = vld [vmem:[%s1339_s29 + $0x30] sm:$0xff]  ;;  %v213_v27 = vld [vmem:[%s1339_s29 + $0x38] sm:$0xff]  ;;  %v214_v28 = vld [vmem:[%s1339_s29 + $0x40] sm:$0xff]  ;;  %v527_v16 = vadd.s32 %v1386_v60, %v494_v6  ;;  %v495_v20 = vadd.s32 56, %v1381_v57  ;;  %s1127_s11 = sshll.u32 %s1199_s16, 4  ;;  %s1128_s11 = int_to_ptr.vmem [resolvable:$false] %s1127_s11 }
  0x51   : > { %968 = vmatprep.mubr.bf16.mxu1 %v246_v10  ;;  %v215_v29 = vld [vmem:[%s1339_s29 + $0x48] sm:$0xff]  ;;  %v228_v30 = vld [vmem:[%s1339_s29 + $0xb0] sm:$0xff]  ;;  %v229_v31 = vld [vmem:[%s1339_s29 + $0xb8] sm:$0xff]  ;;  %v241_v34 = vpack.c.bf16 %v213_v27, %v212_v26  ;;  %v524_v10 = vadd.s32 %v1386_v60, %v491_v63  ;;  %vm554_vm2 = vcmp.lt.s32.totalorder %v522_v5, 600  ;;  %v498_v26 = vadd.s32 80, %v1381_v57  ;;  %p1126_p11 = pneg %p1125_p7  ;;  %s1129_s21 = scalar_lea.vmem %s1128_s11, 256 }
  0x52   : > { %v230_v32 = vld [vmem:[%s1339_s29 + $0xc0] sm:$0xff]  ;;  %v231_v33 = vld [vmem:[%s1339_s29 + $0xc8] sm:$0xff]  ;;  %v242_v35 = vpack.c.bf16 %v215_v29, %v214_v28  ;;  %v249_v36 = vpack.c.bf16 %v229_v31, %v228_v30  ;;  %v216_v38 = vld [vmem:[%s1339_s29 + $0x50] sm:$0xff]  ;;  %v496_v31 = vadd.s32 64, %v1381_v57  ;;  %vm559_vm5 = vcmp.lt.s32.totalorder %v527_v16, 600  ;;  %p1130_p12 = scmp.lt.s32.totalorder %s807_s30, %s1128_s11  ;;  %p1131_p2 = scmp.lt.s32.totalorder %s1129_s21, %s1123_s10 }
  0x53   : > { %941 = vmatpush3.bf16.msra.mxu0 %v1063_v2  ;;  %994 = vmatpush3.bf16.msra.mxu1 %v1063_v2  ;;  %v250_v37 = vpack.c.bf16 %v231_v33, %v230_v32  ;;  %v217_v39 = vld [vmem:[%s1339_s29 + $0x58] sm:$0xff]  ;;  %v218_v40 = vld [vmem:[%s1339_s29 + $0x60] sm:$0xff]  ;;  %v219_v41 = vld [vmem:[%s1339_s29 + $0x68] sm:$0xff]  ;;  %vm556_vm3 = vcmp.lt.s32.totalorder %v524_v10, 600 }
  0x54   : > { %942 = vmatprep.subr.bf16.mxu0 %v1064_v3  ;;  %987 = vmatprep.subr.bf16.mxu1 %v1064_v3  ;;  %v232_v42 = vld [vmem:[%s1339_s29 + $0xd0] sm:$0xff]  ;;  %v233_v43 = vld [vmem:[%s1339_s29 + $0xd8] sm:$0xff]  ;;  %v234_v44 = vld [vmem:[%s1339_s29 + $0xe0] sm:$0xff]  ;;  %v243_v46 = vpack.c.bf16 %v217_v39, %v216_v38  ;;  %v244_v47 = vpack.c.bf16 %v219_v41, %v218_v40  ;;  %p1132_p13 = por %p1131_p2, %p1130_p12 }
  0x55   : > { %v235_v45 = vld [vmem:[%s1339_s29 + $0xe8] sm:$0xff]  ;;  %v251_v48 = vpack.c.bf16 %v233_v43, %v232_v42  ;;  %v220_v50 = vld [vmem:[%s1339_s29 + $0x70] sm:$0xff]  ;;  %v221_v51 = vld [vmem:[%s1339_s29 + $0x78] sm:$0xff]  ;;  %v531_v42 = vadd.s32 %v1386_v60, %v498_v26  ;;  %v497_v43 = vadd.s32 72, %v1381_v57 }
  0x56   : > { %v252_v49 = vpack.c.bf16 %v235_v45, %v234_v44  ;;  %v236_v52 = vld [vmem:[%s1339_s29 + $0xf0] sm:$0xff]  ;;  %v237_v53 = vld [vmem:[%s1339_s29 + $0xf8] sm:$0xff]  ;;  %v245_v54 = vpack.c.bf16 %v221_v51, %v220_v50  ;;  %v1397_v2 = vld [vmem:[%s1583_s2] ss:$0 sm:$0xff]  ;;  %v499_v51 = vadd.s32 88, %v1381_v57  ;;  %p1133_p0 = pnand %p1132_p13, %p1126_p11 }
  0x57   : > { %943 = vmatpush3.bf16.msra.mxu0 %v1064_v3  ;;  %995 = vmatpush3.bf16.msra.mxu1 %v1064_v3  ;;  %v253_v55 = vpack.c.bf16 %v237_v53, %v236_v52  ;;  %v523_v3 = vadd.s32 %v1386_v60, %v490_v58  ;;  %vm563_vm8 = vcmp.lt.s32.totalorder %v531_v42, 600  ;;  %v530_v62 = vadd.s32 %v1386_v60, %v497_v43 }
  0x58   : > { %944 = vmatprep.subr.bf16.mxu0 %v1065_v7  ;;  %988 = vmatprep.subr.bf16.mxu1 %v1065_v7  ;;  %v505_v42 = vadd.s32 136, %v1381_v57 }
  0x59   : > { %vm555_vm1 = vcmp.lt.s32.totalorder %v523_v3, 600  ;;  %vm562_vm10 = vcmp.lt.s32.totalorder %v530_v62, 600 }
  0x5b   : > { %945 = vmatpush3.bf16.msra.mxu0 %v1065_v7  ;;  %996 = vmatpush3.bf16.msra.mxu1 %v1065_v7 }
  0x5c   : > { %946 = vmatprep.subr.bf16.mxu0 %v1066_v11  ;;  %989 = vmatprep.subr.bf16.mxu1 %v1066_v11 }
  0x5f   : > { %947 = vmatpush3.bf16.msra.mxu0 %v1066_v11  ;;  %997 = vmatpush3.bf16.msra.mxu1 %v1066_v11  ;;  %v493_v11 = vadd.s32 40, %v1381_v57 }
  0x60   : > { %948 = vmatprep.subr.bf16.mxu0 %v1067_v12  ;;  %990 = vmatprep.subr.bf16.mxu1 %v1067_v12 }
  0x63   : > { %949 = vmatpush3.bf16.msra.mxu0 %v1067_v12  ;;  %998 = vmatpush3.bf16.msra.mxu1 %v1067_v12 }
  0x64   : > { %950 = vmatprep.subr.bf16.mxu0 %v1068_v13  ;;  %991 = vmatprep.subr.bf16.mxu1 %v1068_v13 }
  0x67   : > { %951 = vmatpush3.bf16.msra.mxu0 %v1068_v13  ;;  %999 = vmatpush3.bf16.msra.mxu1 %v1068_v13  ;;  %v525_v13 = vadd.s32 %v1386_v60, %v492_v0 }
  0x69   : > { %vm557_vm4 = vcmp.lt.s32.totalorder %v525_v13, 600 }
  0x6a   : > { %953 = vmatmul.mubr.bf16.vlgmr.msra.gmra.mxu0 %v239_v22  ;;  %969 = vmatmul.mubr.bf16.vlgmr.msra.gmra.mxu1 %v247_v24  ;;  %v526_v22 = vadd.s32 %v1386_v60, %v493_v11 }
  0x6b   : > { %956 = vmatprep.mubr.bf16.mxu0 %v240_v23  ;;  %972 = vmatprep.mubr.bf16.mxu1 %v248_v25 }
  0x6c   : > { %vm558_vm6 = vcmp.lt.s32.totalorder %v526_v22, 600 }
  0x72   : > { %957 = vmatmul.mubr.bf16.gmra.mxu0 %v241_v34  ;;  %973 = vmatmul.mubr.bf16.gmra.mxu1 %v249_v36  ;;  %v528_v34 = vadd.s32 %v1386_v60, %v495_v20 }
  0x73   : > { %960 = vmatprep.mubr.bf16.mxu0 %v242_v35  ;;  %976 = vmatprep.mubr.bf16.mxu1 %v250_v37 }
  0x74   : > { %vm560_vm7 = vcmp.lt.s32.totalorder %v528_v34, 600 }
  0x7a   : > { %961 = vmatmul.mubr.bf16.gmra.mxu0 %v243_v46  ;;  %977 = vmatmul.mubr.bf16.gmra.mxu1 %v251_v48  ;;  %v529_v48 = vadd.s32 %v1386_v60, %v496_v31 }
  0x7b   : > { %964 = vmatprep.mubr.bf16.mxu0 %v244_v47  ;;  %980 = vmatprep.mubr.bf16.mxu1 %v252_v49 }
  0x7c   : > { %vm561_vm9 = vcmp.lt.s32.totalorder %v529_v48, 600 }
  0x82   : > { %965 = vmatmul.mubr.bf16.gmra.mxu0 %v245_v54  ;;  %981 = vmatmul.mubr.bf16.gmra.mxu1 %v253_v55 }
 0x12a   : > { %v954_v61 = vpop.f32.mrf.mxu0  ;;  %v1392_v1 = vpop.f32.mrf.mxu1 }
 0x12b   : > { %v368_v12 = vadd.f32 %v954_v61, %v1397_v2 }
 0x12c   : > { %v359_v4 = vpop.f32.mrf.mxu0  ;;  %v1403_v8 = vpop.f32.mrf.mxu1 }
 0x12d   : > { %v360_v7 = vadd.f32 %v1397_v2, %v359_v4  ;;  %v651_v24 = vsel %vm555_vm1, %v368_v12, 0.0 }
 0x12e   : > { %v955_v9 = vpop.f32.mrf.mxu0  ;;  %v1409_v14 = vpop.f32.mrf.mxu1  ;;  %v720_v35 = vmul.f32 %v651_v24, %v651_v24 }
 0x12f   : > { %v649_v17 = vsel %vm553_vm0, %v360_v7, 0.0  ;;  %v371_v18 = vadd.f32 %v955_v9, %v1397_v2  ;;  %v532_v7 = vadd.s32 %v1386_v60, %v499_v51  ;;  %v502_v9 = vadd.s32 112, %v1381_v57 }
 0x130   : > { %v362_v15 = vpop.f32.mrf.mxu0  ;;  %v1416_v23 = vpop.f32.mrf.mxu1  ;;  %v718_v27 = vmul.f32 %v649_v17, %v649_v17 }
 0x131   : > { %v363_v19 = vadd.f32 %v1397_v2, %v362_v15  ;;  %v652_v32 = vsel %vm556_vm3, %v371_v18, 0.0  ;;  %v533_v15 = vadd.s32 %v1386_v60, %v500_v56  ;;  %vm564_vm11 = vcmp.lt.s32.totalorder %v532_v7, 600 }
 0x132   : > { %v958_v21 = vpop.f32.mrf.mxu0  ;;  %v1422_v39 = vpop.f32.mrf.mxu1  ;;  %v721_v44 = vmul.f32 %v652_v32, %v652_v32 }
 0x133   : > { %v650_v25 = vsel %vm554_vm2, %v363_v19, 0.0  ;;  %v384_v40 = vadd.f32 %v958_v21, %v1397_v2  ;;  %v503_v19 = vadd.s32 120, %v1381_v57  ;;  %vm565_vm12 = vcmp.lt.s32.totalorder %v533_v15, 600 }
 0x134   : > { %v681_v28 = vadd.f32 %v650_v25, %v649_v17  ;;  %v719_v29 = vmul.f32 %v650_v25, %v650_v25  ;;  %v375_v30 = vpop.f32.mrf.mxu0  ;;  %v1433_v58 = vpop.f32.mrf.mxu1  ;;  %v501_v25 = vadd.s32 104, %v1381_v57 }
 0x135   : > { %v376_v33 = vadd.f32 %v1397_v2, %v375_v30  ;;  %v655_v59 = vsel %vm559_vm5, %v384_v40, 0.0 }
 0x136   : > { %v682_v36 = vadd.f32 %v681_v28, %v651_v24  ;;  %v750_v37 = vadd.f32 %v719_v29, %v718_v27  ;;  %v959_v38 = vpop.f32.mrf.mxu0  ;;  %v724_v10 = vmul.f32 %v655_v59, %v655_v59  ;;  %v1443_v16 = vpop.f32.mrf.mxu1  ;;  %v535_v28 = vadd.s32 %v1386_v60, %v502_v9 }
 0x137   : > { %v653_v41 = vsel %vm557_vm4, %v376_v33, 0.0  ;;  %v387_v49 = vadd.f32 %v959_v38, %v1397_v2 }
 0x138   : > { %v751_v45 = vadd.f32 %v750_v37, %v720_v35  ;;  %v683_v46 = vadd.f32 %v682_v36, %v652_v32  ;;  %v378_v47 = vpop.f32.mrf.mxu0  ;;  %v722_v53 = vmul.f32 %v653_v41, %v653_v41  ;;  %v1451_v33 = vpop.f32.mrf.mxu1  ;;  %v536_v36 = vadd.s32 %v1386_v60, %v503_v19 }
 0x139   : > { %v379_v50 = vadd.f32 %v1397_v2, %v378_v47  ;;  %v656_v5 = vsel %vm560_vm7, %v387_v49, 0.0  ;;  %v504_v37 = vadd.s32 128, %v1381_v57  ;;  %vm567_vm13 = vcmp.lt.s32.totalorder %v535_v28, 600 }
 0x13a   : > { %v684_v52 = vadd.f32 %v683_v46, %v653_v41  ;;  %v752_v54 = vadd.f32 %v751_v45, %v721_v44  ;;  %v962_v55 = vpop.f32.mrf.mxu0  ;;  %v725_v20 = vmul.f32 %v656_v5, %v656_v5  ;;  %v534_v44 = vadd.s32 %v1386_v60, %v501_v25 }
 0x13b   : > { %v654_v61 = vsel %vm558_vm6, %v379_v50, 0.0  ;;  %v400_v17 = vadd.f32 %v962_v55, %v1397_v2  ;;  %v506_v50 = vadd.s32 144, %v1381_v57  ;;  %vm568_vm14 = vcmp.lt.s32.totalorder %v536_v36, 600 }
 0x13c   : > { %v753_v63 = vadd.f32 %v752_v54, %v722_v53  ;;  %v685_v0 = vadd.f32 %v684_v52, %v654_v61  ;;  %v723_v3 = vmul.f32 %v654_v61, %v654_v61  ;;  %v391_v4 = vpop.f32.mrf.mxu0  ;;  %v1462_v52 = vpop.f32.mrf.mxu1  ;;  %v537_v55 = vadd.s32 %v1386_v60, %v504_v37 }
 0x13d   : > { %v392_v6 = vadd.f32 %v1397_v2, %v391_v4  ;;  %v659_v34 = vsel %vm563_vm8, %v400_v17, 0.0  ;;  %vm566_vm15 = vcmp.lt.s32.totalorder %v534_v44, 600  ;;  %v538_v4 = vadd.s32 %v1386_v60, %v505_v42 }
 0x13e   : > { %v686_v11 = vadd.f32 %v685_v0, %v655_v59  ;;  %v754_v12 = vadd.f32 %v753_v63, %v723_v3  ;;  %v963_v13 = vpop.f32.mrf.mxu0  ;;  %v728_v47 = vmul.f32 %v659_v34, %v659_v34  ;;  %v507_v3 = vadd.s32 152, %v1381_v57 }
 0x13f   : > { %v657_v18 = vsel %vm561_vm9, %v392_v6, 0.0  ;;  %v403_v26 = vadd.f32 %v963_v13, %v1397_v2  ;;  %v539_v9 = vadd.s32 %v1386_v60, %v506_v50  ;;  %vm569_vm0 = vcmp.lt.s32.totalorder %v537_v55, 600 }
 0x140   : > { %v755_v21 = vadd.f32 %v754_v12, %v724_v10  ;;  %v687_v22 = vadd.f32 %v686_v11, %v656_v5  ;;  %v394_v24 = vpop.f32.mrf.mxu0  ;;  %v726_v30 = vmul.f32 %v657_v18, %v657_v18  ;;  %v1472_v10 = vpop.f32.mrf.mxu1  ;;  %v424_v12 = vadd.f32 %v1397_v2, %v1403_v8 }
 0x141   : > { %v395_v27 = vadd.f32 %v1397_v2, %v394_v24  ;;  %v660_v45 = vsel %vm564_vm11, %v403_v26, 0.0  ;;  %v508_v19 = vadd.s32 160, %v1381_v57  ;;  %vm570_vm1 = vcmp.lt.s32.totalorder %v538_v4, 600 }
 0x142   : > { %v688_v29 = vadd.f32 %v687_v22, %v657_v18  ;;  %v756_v31 = vadd.f32 %v755_v21, %v725_v20  ;;  %v966_v32 = vpop.f32.mrf.mxu0  ;;  %v729_v56 = vmul.f32 %v660_v45, %v660_v45  ;;  %v540_v21 = vadd.s32 %v1386_v60, %v507_v3 }
 0x143   : > { %v658_v35 = vsel %vm562_vm10, %v395_v27, 0.0  ;;  %v416_v53 = vadd.f32 %v966_v32, %v1397_v2  ;;  %v427_v22 = vadd.f32 %v1397_v2, %v1416_v23  ;;  %v509_v8 = vadd.s32 168, %v1381_v57  ;;  %v1483_v27 = vpop.f32.mrf.mxu1 }
 0x144   : > { %v757_v38 = vadd.f32 %v756_v31, %v726_v30  ;;  %v689_v40 = vadd.f32 %v688_v29, %v658_v35  ;;  %v727_v41 = vmul.f32 %v658_v35, %v658_v35  ;;  %v407_v43 = vpop.f32.mrf.mxu0  ;;  %v432_v28 = vadd.f32 %v1392_v1, %v1397_v2 }
 0x145   : > { %v408_v46 = vadd.f32 %v1397_v2, %v407_v43  ;;  %v663_v11 = vsel %vm567_vm13, %v416_v53, 0.0  ;;  %vm571_vm2 = vcmp.lt.s32.totalorder %v539_v9, 600  ;;  %v665_v29 = vsel %vm569_vm0, %v424_v12, 0.0  ;;  %v458_v43 = vpop.f32.mrf.mxu1 }
 0x146   : > { %v690_v48 = vadd.f32 %v689_v40, %v659_v34  ;;  %v758_v49 = vadd.f32 %v757_v38, %v727_v41  ;;  %v967_v51 = vpop.f32.mrf.mxu0  ;;  %v732_v24 = vmul.f32 %v663_v11, %v663_v11  ;;  %v510_v30 = vadd.s32 176, %v1381_v57 }
 0x147   : > { %v661_v54 = vsel %vm565_vm12, %v408_v46, 0.0  ;;  %v419_v63 = vadd.f32 %v967_v51, %v1397_v2  ;;  %v541_v23 = vadd.s32 %v1386_v60, %v508_v19  ;;  %v435_v35 = vadd.f32 %v1409_v14, %v1397_v2 }
 0x148   : > { %v759_v59 = vadd.f32 %v758_v49, %v728_v47  ;;  %v691_v61 = vadd.f32 %v690_v48, %v660_v45  ;;  %v410_v62 = vpop.f32.mrf.mxu0  ;;  %v730_v6 = vmul.f32 %v661_v54, %v661_v54  ;;  %vm572_vm3 = vcmp.lt.s32.totalorder %v540_v21, 600 }
 0x149   : > { %v411_v0 = vadd.f32 %v1397_v2, %v410_v62  ;;  %v664_v20 = vsel %vm568_vm14, %v419_v63, 0.0  ;;  %v666_v36 = vsel %vm570_vm1, %v427_v22, 0.0  ;;  %v511_v37 = vadd.s32 184, %v1381_v57 }
 0x14a   : > { %v692_v5 = vadd.f32 %v691_v61, %v661_v54  ;;  %v760_v7 = vadd.f32 %v759_v59, %v729_v56  ;;  %v733_v31 = vmul.f32 %v664_v20, %v664_v20  ;;  %v734_v38 = vmul.f32 %v665_v29, %v665_v29 }
 0x14b   : > { %v662_v13 = vsel %vm566_vm15, %v411_v0, 0.0  ;;  %v542_v41 = vadd.s32 %v1386_v60, %v509_v8  ;;  %v667_v44 = vsel %vm571_vm2, %v432_v28, 0.0  ;;  %v543_v45 = vadd.s32 %v1386_v60, %v510_v30 }
 0x14c   : > { %v761_v15 = vadd.f32 %v760_v7, %v730_v6  ;;  %v693_v17 = vadd.f32 %v692_v5, %v662_v13  ;;  %v731_v18 = vmul.f32 %v662_v13, %v662_v13  ;;  %v440_v46 = vadd.f32 %v1397_v2, %v1433_v58  ;;  %v1505_v58 = vpop.f32.mrf.mxu1 }
 0x14d   : > { %v512_v14 = vadd.s32 192, %v1381_v57  ;;  %v735_v47 = vmul.f32 %v666_v36, %v666_v36  ;;  %vm573_vm4 = vcmp.lt.s32.totalorder %v541_v23, 600  ;;  %v668_v49 = vsel %vm572_vm3, %v435_v35, 0.0 }
 0x14e   : > { %v694_v25 = vadd.f32 %v693_v17, %v663_v11  ;;  %v762_v26 = vadd.f32 %v761_v15, %v731_v18  ;;  %v544_v50 = vadd.s32 %v1386_v60, %v511_v37  ;;  %v443_v51 = vadd.f32 %v1397_v2, %v1451_v33  ;;  %v471_v12 = vpop.f32.mrf.mxu1 }
 0x14f   : > { %v513_v53 = vadd.s32 200, %v1381_v57  ;;  %v736_v54 = vmul.f32 %v667_v44, %v667_v44  ;;  %vm574_vm5 = vcmp.lt.s32.totalorder %v542_v41, 600  ;;  %v448_v59 = vadd.f32 %v1422_v39, %v1397_v2 }
 0x150   : > { %v763_v32 = vadd.f32 %v762_v26, %v732_v24  ;;  %v695_v34 = vadd.f32 %v694_v25, %v664_v20  ;;  %v669_v61 = vsel %vm573_vm4, %v440_v46, 0.0  ;;  %v514_v62 = vadd.s32 208, %v1381_v57  ;;  %v983_v28 = vpop.f32.mrf.mxu1 }
 0x151   : > { %v545_v63 = vadd.s32 %v1386_v60, %v512_v14  ;;  %v737_v0 = vmul.f32 %v668_v49, %v668_v49  ;;  %vm575_vm6 = vcmp.lt.s32.totalorder %v543_v45, 600  ;;  %v451_v4 = vadd.f32 %v1443_v16, %v1397_v2 }
 0x152   : > { %v696_v1 = vadd.f32 %v695_v34, %v665_v29  ;;  %v764_v40 = vadd.f32 %v763_v32, %v733_v31  ;;  %v670_v5 = vsel %vm574_vm5, %v443_v51, 0.0  ;;  %v515_v6 = vadd.s32 216, %v1381_v57  ;;  %v474_v41 = vpop.f32.mrf.mxu1 }
 0x153   : > { %v546_v7 = vadd.s32 %v1386_v60, %v513_v53  ;;  %v738_v11 = vmul.f32 %v669_v61, %v669_v61  ;;  %vm576_vm7 = vcmp.lt.s32.totalorder %v544_v50, 600  ;;  %v671_v13 = vsel %vm575_vm6, %v448_v59, 0.0 }
 0x154   : > { %v697_v42 = vadd.f32 %v696_v1, %v666_v36  ;;  %v765_v48 = vadd.f32 %v764_v40, %v734_v38  ;;  %v547_v15 = vadd.s32 %v1386_v60, %v514_v62  ;;  %v456_v17 = vadd.f32 %v1397_v2, %v1472_v10 }
 0x155   : > { %vm577_vm8 = vcmp.lt.s32.totalorder %v545_v63, 600  ;;  %v739_v16 = vmul.f32 %v670_v5, %v670_v5  ;;  %v516_v20 = vadd.s32 224, %v1381_v57  ;;  %v672_v21 = vsel %vm576_vm7, %v451_v4, 0.0 }
 0x156   : > { %v698_v55 = vadd.f32 %v697_v42, %v667_v44  ;;  %v766_v56 = vadd.f32 %v765_v48, %v735_v47  ;;  %v548_v22 = vadd.s32 %v1386_v60, %v515_v6  ;;  %v459_v24 = vadd.f32 %v1397_v2, %v458_v43 }
 0x157   : > { %vm578_vm9 = vcmp.lt.s32.totalorder %v546_v7, 600  ;;  %v740_v25 = vmul.f32 %v671_v13, %v671_v13  ;;  %v517_v29 = vadd.s32 232, %v1381_v57  ;;  %v464_v10 = vadd.f32 %v1462_v52, %v1397_v2 }
 0x158   : > { %v767_v3 = vadd.f32 %v766_v56, %v736_v54  ;;  %v699_v33 = vadd.f32 %v698_v55, %v668_v49  ;;  %vm579_vm10 = vcmp.lt.s32.totalorder %v547_v15, 600  ;;  %v673_v30 = vsel %vm577_vm8, %v456_v17, 0.0 }
 0x159   : > { %v518_v31 = vadd.s32 240, %v1381_v57  ;;  %v741_v32 = vmul.f32 %v672_v21, %v672_v21  ;;  %v549_v35 = vadd.s32 %v1386_v60, %v516_v20  ;;  %v467_v36 = vadd.f32 %v1483_v27, %v1397_v2 }
 0x15a   : > { %v700_v9 = vadd.f32 %v699_v33, %v669_v61  ;;  %v768_v39 = vadd.f32 %v767_v3, %v737_v0  ;;  %vm580_vm11 = vcmp.lt.s32.totalorder %v548_v22, 600  ;;  %v674_v37 = vsel %vm578_vm9, %v459_v24, 0.0 }
 0x15b   : > { %v519_v38 = vadd.s32 248, %v1381_v57  ;;  %v742_v52 = vmul.f32 %v673_v30, %v673_v30  ;;  %v550_v43 = vadd.s32 %v1386_v60, %v517_v29  ;;  %v675_v44 = vsel %vm579_vm10, %v464_v10, 0.0 }
 0x15c   : > { %v769_v18 = vadd.f32 %v768_v39, %v738_v11  ;;  %v701_v19 = vadd.f32 %v700_v9, %v670_v5  ;;  %v551_v45 = vadd.s32 %v1386_v60, %v518_v31  ;;  %v472_v46 = vadd.f32 %v1397_v2, %v471_v12 }
 0x15d   : > { %v743_v27 = vmul.f32 %v674_v37, %v674_v37  ;;  %vm581_vm12 = vcmp.lt.s32.totalorder %v549_v35, 600  ;;  %v676_v47 = vsel %vm580_vm11, %v467_v36, 0.0  ;;  %v552_v48 = vadd.s32 %v1386_v60, %v519_v38 }
 0x15e   : > { %v702_v26 = vadd.f32 %v701_v19, %v671_v13  ;;  %v770_v8 = vadd.f32 %v769_v18, %v739_v16  ;;  %v475_v57 = vadd.f32 %v1397_v2, %v474_v41  ;;  %v744_v49 = vmul.f32 %v675_v44, %v675_v44 }
 0x15f   : > { %vm582_vm13 = vcmp.lt.s32.totalorder %v550_v43, 600  ;;  %v480_v53 = vadd.f32 %v1505_v58, %v1397_v2  ;;  %v677_v54 = vsel %vm581_vm12, %v472_v46, 0.0  ;;  %v745_v55 = vmul.f32 %v676_v47, %v676_v47 }
 0x160   : > { %v771_v34 = vadd.f32 %v770_v8, %v740_v25  ;;  %v703_v23 = vadd.f32 %v702_v26, %v672_v21  ;;  %vm583_vm14 = vcmp.lt.s32.totalorder %v551_v45, 600  ;;  %v483_v61 = vadd.f32 %v983_v28, %v1397_v2 }
 0x161   : > { %v678_v62 = vsel %vm582_vm13, %v475_v57, 0.0  ;;  %v746_v0 = vmul.f32 %v677_v54, %v677_v54  ;;  %vm584_vm15 = vcmp.lt.s32.totalorder %v552_v48, 600  ;;  %v679_v3 = vsel %vm583_vm14, %v480_v53, 0.0 }
 0x162   : > { %v704_v1 = vadd.f32 %v703_v23, %v673_v30  ;;  %v772_v40 = vadd.f32 %v771_v34, %v741_v32  ;;  %v747_v5 = vmul.f32 %v678_v62, %v678_v62  ;;  %v680_v6 = vsel %vm584_vm15, %v483_v61, 0.0 }
 0x163   : > { %v748_v7 = vmul.f32 %v679_v3, %v679_v3  ;;  %v749_v11 = vmul.f32 %v680_v6, %v680_v6  ;;  %vm787_vm0 = vcmask 1040384   ;;  %vm789_vm1 = vcmask 1041408  }
 0x164   : > { %v773_v14 = vadd.f32 %v772_v40, %v742_v52  ;;  %v705_v42 = vadd.f32 %v704_v1, %v674_v37 }
 0x166   : > { %v706_v50 = vadd.f32 %v705_v42, %v675_v44  ;;  %v774_v51 = vadd.f32 %v773_v14, %v743_v27 }
 0x168   : > { %v775_v56 = vadd.f32 %v774_v51, %v744_v49  ;;  %v707_v59 = vadd.f32 %v706_v50, %v676_v47 }
 0x16a   : > { %v708_v63 = vadd.f32 %v707_v59, %v677_v54  ;;  %v776_v60 = vadd.f32 %v775_v56, %v745_v55 }
 0x16c   : > { %v777_v33 = vadd.f32 %v776_v60, %v746_v0  ;;  %v709_v4 = vadd.f32 %v708_v63, %v678_v62 }
 0x16e   : > { %v710_v58 = vadd.f32 %v709_v4, %v679_v3  ;;  %v778_v9 = vadd.f32 %v777_v33, %v747_v5 }
 0x170   : > { %v711_v39 = vadd.f32 %v710_v58, %v680_v6  ;;  %v779_v12 = vadd.f32 %v778_v9, %v748_v7 }
 0x172   : > { %v712_v13 = vrot.slane %v711_v39, 4  ;;  %v780_v2 = vadd.f32 %v779_v12, %v749_v11 }
 0x174   : > { %v713_v15 = vadd.f32 %v712_v13, %v711_v39  ;;  %v781_v17 = vrot.slane %v780_v2, 4 }
 0x176   : > { %v714_v18 = vrot.slane %v713_v15, 2  ;;  %v782_v19 = vadd.f32 %v781_v17, %v780_v2 }
 0x178   : > { %v715_v16 = vadd.f32 %v714_v18, %v713_v15  ;;  %v783_v20 = vrot.slane %v782_v19, 2 }
 0x17a   : > { %v716_v21 = vrot.slane %v715_v16, 1  ;;  %v784_v22 = vadd.f32 %v783_v20, %v782_v19 }
 0x17c   : > { %v785_v24 = vrot.slane %v784_v22, 1  ;;  %v717_v25 = vadd.f32 %v716_v21, %v715_v16 }
 0x17e   : > { %v786_v26 = vadd.f32 %v785_v24, %v784_v22 }
 0x180   : > { %v788_v8 = vsel %vm787_vm0, %v717_v25, %v786_v26 }
 0x181   : > { %v790_v28 = vsel %vm789_vm1, %v788_v8, 0.0 }
 0x182   : > { %791 = vst [vmem:[%s203_s25] sm:$0xff] %v790_v28 }
 0x183   : > { %1136 = shalt.err (!%p1133_p0)
}
 0x184   : > { %s1137_s27 = scalar_lea.hbm %s1545_s8, 128  ;;  %s1141_s29 = scalar_lea.hbm %s1584_s3, 384 }
 0x185   : > { %p1138_p5 = scmp.ne.s32.totalorder %s1545_s8, %s1137_s27  ;;  %p1142_p4 = scmp.lt.s32.totalorder %s1545_s8, %s1584_s3 }
 0x186   : > { %p1143_p6 = scmp.lt.s32.totalorder %s1141_s29, %s1137_s27 }
 0x187   : > { %p1139_p9 = pnand %p1138_p5, %p1600_p10 }
 0x188   : > { %p1144_p8 = por %p1143_p6, %p1142_p4 }
 0x189   : > { %p1140_p1 = pneg %p1139_p9 }
 0x18b   : > { %p1145_p3 = pnand %p1144_p8, %p1140_p1 }
 0x18d   : > { %1148 = shalt.err (!%p1145_p3)
}
 0x18e   : > { %1006 = dma.vmem_to_hbm [thread:$0]  (%p1600_p10), %s807_s30, 128, %s1545_s8, %s793_s9  }
 0x18f PF: > { %p1023_p7 = scmp.ge.s32.totalorder %s1191_s15, 2  ;;  %s818_s17 = sand.u32 1, %s1179_s12  }
 0x190   : > { %p1601_p11 = scmp.ne.s32.totalorder %s1590_s19, 0  ;;  %s819_s22 = scalar_lea.sflag [#allocation4], %s818_s17 }
 0x192   : > { %p1017_p12 = pnand %p1023_p7, %p1601_p11 }
 0x194   : > { %p1018_p2 = pneg %p1017_p12 }
 0x196   : > { %1174 = dma.done.wait (%p1018_p2), %s819_s22, 128  }
 0x197   : > { %1176 = vsyncadd (%p1018_p2), %s819_s22, 4294967168  ;;  %p17_p13 = scmp.ge.s32.totalorder %s1273_s24, 5   ;;  %s1602_s12 = smov %s1183_s13 }
 0x198   : > { %s1603_s13 = smov %s1187_s14  ;;  %s1604_s14 = smov %s1290_s5 }
 0x199   : > { %s1605_s15 = smov %s1273_s24  ;;  %19 = sbr.rel (!%p17_p13) target bundleno = 6 (0x6), region = 81 }
 0x19e   :  { %824 = vsyncpa [#allocation3], 1 }
 0x19f   :  { %826 = vsyncpa [#allocation3 + $0x1], 1 }
 0x1a0   :  { %827 = vsyncpa [#allocation6], 1 }
 0x1a1   :  { %828 = vsyncpa [#allocation4], 1 }
 0x1a2   :  { %830 = vsyncpa [#allocation4 + $0x1], 1 }

</bundles_post_ra>
